<compile_context>
chip_gen: v5e
topology: v5e:2x2
jax: 0.10.0
libtpu: 0.0.40
codegen_flags: <defaults>
</compile_context>

<pallas_src>
from functools import partial

import jax
import jax.numpy as jnp
import numpy as np
from jax.experimental import pallas as pl
from jax.experimental.pallas import tpu as pltpu


_LANE = 128     # lane width
_CTILE = 256    # label tile (MXU N width on v6e/v7x)
_TB = 8         # images per grid step (sublane multiple)


def _ceil_to(x, m):
    return ((x + m - 1) // m) * m


# ----------------------------------------------------------------------------
# Fused kernel, grid = (batch tiles, label tiles).
#
#   label tile c == 0 (once per batch tile):
#     qp   = W_query @ patches_2d            [Q, TB*Kp]   (contract P first)
#     qo   = reshape(qp) @ W_patch           [Q*TB, Hp]
#     proj = qo @ W_proj                     [Q*TB, Dp]
#     feat = L2-normalize(proj) -> scratch   [Q*TB, Dp]   (image_embeds_proj)
#   every label tile c:
#     sim  = feat @ text_T[:, tile c]        [Q*TB, CT]
#     out  = max over Q                      [TB, CT]
# ----------------------------------------------------------------------------
def _blip2cl_kernel(p_ref, wq_ref, wp_ref, wpr_ref, t_ref, o_ref, feat_ref):
    Q = wq_ref.shape[0]
    Kp = wp_ref.shape[0]
    TB = p_ref.shape[1] // Kp
    CT = t_ref.shape[1]

    # Feature extraction once per batch tile (label axis is the inner,
    # sequentially iterated "arbitrary" grid axis, so c == 0 runs first).
    @pl.when(pl.program_id(1) == 0)
    def _():
        # (1) Contract the patch axis P first: one wide matmul, N = TB*Kp.
        qp = jnp.dot(wq_ref[...], p_ref[...],
                     preferred_element_type=jnp.float32)            # [Q, TB*Kp]
        qp = qp.reshape(Q * TB, Kp).astype(jnp.bfloat16)            # rows = (q, b)

        # (2) Patch-pixel embedding -> vision projection (bf16 ops, f32 acc).
        qo = jnp.dot(qp, wp_ref[...],
                     preferred_element_type=jnp.float32)            # [Q*TB, Hp]
        proj = jnp.dot(qo.astype(jnp.bfloat16), wpr_ref[...],
                       preferred_element_type=jnp.float32)          # [Q*TB, Dp]

        # (3) L2-normalize rows -> image_embeds_proj (padded cols are zero,
        #     so the norm only sees the real D features).
        inv = jax.lax.rsqrt(jnp.sum(proj * proj, axis=-1, keepdims=True) + 1e-12)
        feat_ref[...] = (proj * inv).astype(jnp.bfloat16)

    # (4) Retrieval logits for this label tile: (feat @ text^T).max over queries.
    sim = jnp.dot(feat_ref[...], t_ref[...],
                  preferred_element_type=jnp.float32)               # [Q*TB, CT]
    o_ref[...] = jnp.max(sim.reshape(Q, TB, CT), axis=0)            # [TB, CT]


@partial(jax.jit, static_argnames=("patch_size", "num_labels"))
def blip2cl_forward(images, w_query_bf16, w_patch_bf16, w_proj_bf16,
                    text_t_bf16, *, patch_size, num_labels):
    B, C, H, W = images.shape
    Q, P = w_query_bf16.shape
    Kp, Hp = w_patch_bf16.shape
    Dp = w_proj_bf16.shape[1]
    Cp = text_t_bf16.shape[1]
    ps = patch_size
    nh, nw = H // ps, W // ps
    ppix = C * ps * ps
    assert nh * nw == P and ppix <= Kp

    # Cast to bf16 BEFORE the patchify transpose (halves that extra HBM pass).
    # Layout is already the kernel-friendly [P, B, ppix] (patch axis leading)
    # so the in-kernel W_query contraction is a single 2D matmul.
    # TODO(synk): fold patch extraction into the kernel DMA (strided/Element
    # index_map on the raw NCHW image) to remove this pass entirely.
    x = images.astype(jnp.bfloat16)
    patches = x.reshape(B, C, nh, ps, nw, ps).transpose(2, 4, 0, 1, 3, 5)
    patches = patches.reshape(P, B, ppix)                            # [P, B, ppix]

    # Pad batch to a sublane multiple of TB (padded rows are zero and sliced
    # off) and the pixel dim to lane width -> lane-dense 2D slab [P, B_pad*Kp].
    # NOTE(v7x): for tiny batches with a single label tile, padding B to 2*TB
    # would give >=2 "parallel" grid steps so both TensorCores are used.
    B_pad = _ceil_to(max(B, _TB), _TB)
    patches = jnp.pad(patches, ((0, 0), (0, B_pad - B), (0, Kp - ppix)))
    patches2 = patches.reshape(P, B_pad * Kp)

    nb = B_pad // _TB
    ct = min(Cp, _CTILE)
    nc = Cp // ct

    out = pl.pallas_call(
        _blip2cl_kernel,
        out_shape=jax.ShapeDtypeStruct((B_pad, Cp), jnp.float32),
        grid=(nb, nc),
        in_specs=[
            pl.BlockSpec((P, _TB * Kp), lambda b, c: (0, b)),
            # Grid-invariant weights: constant index_map -> no re-DMA across
            # steps. Padded bf16 footprint is <=64 KB each, so the default
            # double buffering costs <0.5 MB; pipeline_mode=pl.Buffered(1)
            # could reclaim it on v7x if VMEM gets tight at real shapes.
            pl.BlockSpec((Q, P), lambda b, c: (0, 0)),
            pl.BlockSpec((Kp, Hp), lambda b, c: (0, 0)),
            pl.BlockSpec((Hp, Dp), lambda b, c: (0, 0)),
            pl.BlockSpec((Dp, ct), lambda b, c: (0, c)),
        ],
        out_specs=pl.BlockSpec((_TB, ct), lambda b, c: (b, c)),
        scratch_shapes=[pltpu.VMEM((Q * _TB, Dp), jnp.bfloat16)],
        compiler_params=pltpu.CompilerParams(
            dimension_semantics=("parallel", "arbitrary")),
    )(patches2, w_query_bf16, w_patch_bf16, w_proj_bf16, text_t_bf16)

    # Padded label columns carry sim == 0 logits; always slice BEFORE any
    # argmax/softmax consumer.
    return out[:B, :num_labels]


# ----------------------------------------------------------------------------
# Module wrapper (mirrors BLIP2CL.forward with texts=None -> text_label_embeds)
# ----------------------------------------------------------------------------
class BLIP2CLPallas:
    def __init__(self, key, *, image_size=16, patch_size=4, in_chans=3,
                 n_query=8, hidden=32, proj_dim=32, num_labels=8):
        nh = image_size // patch_size
        n_patches = nh * nh
        ppix = in_chans * patch_size * patch_size
        k1, k2, k3, k4 = jax.random.split(key, 4)

        self.patch_size = patch_size
        self.num_labels = num_labels

        # Stand-in feature-extractor weights (f32 masters).
        # TODO(synk): pretrained BLIP-2 ViT + Q-Former replaced by this
        # deterministic linear stand-in (same output shape / normalization).
        self.w_query = 0.02 * jax.random.normal(k1, (n_query, n_patches), jnp.float32)
        self.w_patch = 0.02 * jax.random.normal(k2, (ppix, hidden), jnp.float32)
        self.w_proj = 0.02 * jax.random.normal(k3, (hidden, proj_dim), jnp.float32)

        # Stand-in for set_encoded_labels / encode_labels_blip: L2-normalized.
        t = jax.random.normal(k4, (num_labels, proj_dim), jnp.float32)
        self.text_label_embeds = t * jax.lax.rsqrt(
            jnp.sum(t * t, axis=-1, keepdims=True) + 1e-12)           # [C, D]

        # Static kernel operands: bf16, zero-padded to lane-dense shapes.
        kp = _ceil_to(ppix, _LANE)
        hp = _ceil_to(hidden, _LANE)
        dp = _ceil_to(proj_dim, _LANE)
        cp = _ceil_to(num_labels, _CTILE)   # 256-aligned for v6e/v7x MXU width
        self._w_query_bf16 = self.w_query.astype(jnp.bfloat16)        # [Q, P]
        self._w_patch_bf16 = jnp.zeros((kp, hp), jnp.bfloat16).at[
            :ppix, :hidden].set(self.w_patch.astype(jnp.bfloat16))
        self._w_proj_bf16 = jnp.zeros((hp, dp), jnp.bfloat16).at[
            :hidden, :proj_dim].set(self.w_proj.astype(jnp.bfloat16))
        # Text table pre-transposed to [D, Cpad] so the sim matmul RHS is [K, N].
        # TODO(synk): on v7x an fp8 text table would halve its VMEM and double
        # the sim-matmul MXU rate (accuracy budget permitting).
        self._text_t_bf16 = jnp.zeros((dp, cp), jnp.bfloat16).at[
            :proj_dim, :num_labels].set(
                self.text_label_embeds.T.astype(jnp.bfloat16))

    def __call__(self, images, texts=None):
        if texts is not None:
            # TODO(synk): BLIP-2 text encoder / tokenizer has no Pallas equivalent.
            raise NotImplementedError(
                "texts=None path only (uses text_label_embeds)")
        return blip2cl_forward(images, self._w_query_bf16, self._w_patch_bf16,
                               self._w_proj_bf16, self._text_t_bf16,
                               patch_size=self.patch_size,
                               num_labels=self.num_labels)


# ----------------------------------------------------------------------------
# Pure-JAX reference matching the kernel's dtype path (bf16 matmul operands,
# f32 accumulation, bf16-rounded intermediates, P contracted first).
# ----------------------------------------------------------------------------
def reference_forward(model, images):
    ps = model.patch_size
    B, C, H, W = images.shape
    nh, nw = H // ps, W // ps
    patches = images.astype(jnp.bfloat16).reshape(B, C, nh, ps, nw, ps)
    patches = patches.transpose(0, 2, 4, 1, 3, 5).reshape(B, nh * nw, C * ps * ps)
    wq = model.w_query.astype(jnp.bfloat16)
    wp = model.w_patch.astype(jnp.bfloat16)
    wpr = model.w_proj.astype(jnp.bfloat16)
    txt = model.text_label_embeds.astype(jnp.bfloat16)

    qp = jnp.einsum('qp,bpk->bqk', wq, patches,
                    preferred_element_type=jnp.float32).astype(jnp.bfloat16)
    qo = jnp.einsum('bqk,kh->bqh', qp, wp,
                    preferred_element_type=jnp.float32).astype(jnp.bfloat16)
    proj = jnp.einsum('bqh,hd->bqd', qo, wpr,
                      preferred_element_type=jnp.float32)
    proj = proj * jax.lax.rsqrt(jnp.sum(proj * proj, axis=-1, keepdims=True) + 1e-12)
    sim = jnp.einsum('bqd,cd->bqc', proj.astype(jnp.bfloat16), txt,
                     preferred_element_type=jnp.float32)
    return jnp.max(sim, axis=1)


if __name__ == "__main__":
    key = jax.random.PRNGKey(0)
    k_img, k_model = jax.random.split(key)

    # Small shapes: batch=2, channels=3, spatial=16x16, 8 query tokens,
    # hidden=32, proj_dim=32, 8 text labels.
    images = jax.random.normal(k_img, (2, 3, 16, 16), dtype=jnp.float32)  # NCHW
    model = BLIP2CLPallas(k_model, image_size=16, patch_size=4, in_chans=3,
                          n_query=8, hidden=32, proj_dim=32, num_labels=8)

    logits = jax.block_until_ready(model(images))                     # [2, 8]
    assert logits.shape == (2, 8)

    ref = reference_forward(model, images)
    np.testing.assert_allclose(np.asarray(logits), np.asarray(ref),
                               rtol=2e-2, atol=2e-2)

    print("KERNEL_OK")
</pallas_src>

<mosaic_0001>
module attributes {stable_mosaic.version = 11 : i64} {
  func.func @_blip2cl_kernel(%arg0: i32, %arg1: i32, %arg2: memref<16x1024xbf16, #tpu.memory_space<vmem>>, %arg3: memref<8x16xbf16, #tpu.memory_space<vmem>>, %arg4: memref<128x128xbf16, #tpu.memory_space<vmem>>, %arg5: memref<128x128xbf16, #tpu.memory_space<vmem>>, %arg6: memref<128x256xbf16, #tpu.memory_space<vmem>>, %arg7: memref<8x256xf32, #tpu.memory_space<vmem>>, %arg8: memref<64x128xbf16, #tpu.memory_space<vmem>>) attributes {dimension_semantics = [#tpu.dimension_semantics<parallel>, #tpu.dimension_semantics<arbitrary>], iteration_bounds = array<i64: 1, 1>, scalar_prefetch = 0 : i64, scratch_operands = 1 : i64, tpu.core_type = #tpu.core_type<tc>, window_params = [{transform_indices = @transform_0, window_bounds = array<i64: 16, 1024>}, {pipeline_mode = #tpu.pipeline_mode<synchronous>, transform_indices = @transform_1, window_bounds = array<i64: 8, 16>}, {pipeline_mode = #tpu.pipeline_mode<synchronous>, transform_indices = @transform_2, window_bounds = array<i64: 128, 128>}, {pipeline_mode = #tpu.pipeline_mode<synchronous>, transform_indices = @transform_3, window_bounds = array<i64: 128, 128>}, {transform_indices = @transform_4, window_bounds = array<i64: 128, 256>}, {transform_indices = @transform_5, window_bounds = array<i64: 8, 256>}]} {
    %c0_i32 = arith.constant 0 : i32
    %0 = arith.cmpi eq, %arg1, %c0_i32 : i32
    %1 = arith.extui %0 : i1 to i32
    %c0_i32_0 = arith.constant 0 : i32
    %2 = arith.cmpi ne, %1, %c0_i32_0 : i32
    scf.if %2 {
      %c0_7 = arith.constant 0 : index
      %c0_8 = arith.constant 0 : index
      %9 = vector.load %arg3[%c0_7, %c0_8] : memref<8x16xbf16, #tpu.memory_space<vmem>>, vector<8x16xbf16>
      %c0_9 = arith.constant 0 : index
      %c0_10 = arith.constant 0 : index
      %10 = vector.load %arg2[%c0_9, %c0_10] : memref<16x1024xbf16, #tpu.memory_space<vmem>>, vector<16x1024xbf16>
      %cst_11 = arith.constant dense<0.000000e+00> : vector<8x1024xf32>
      %11 = tpu.matmul %9, %10, %cst_11 {dimension_numbers = #tpu.dot_dimension_numbers<[1], [0], [0], [1], [0, 0, 1, 1], [], []>} : vector<8x16xbf16>, vector<16x1024xbf16>, vector<8x1024xf32> -> vector<8x1024xf32>
      %12 = vector.shape_cast %11 : vector<8x1024xf32> to vector<64x128xf32>
      %13 = arith.truncf %12 : vector<64x128xf32> to vector<64x128xbf16>
      %c0_12 = arith.constant 0 : index
      %c0_13 = arith.constant 0 : index
      %14 = vector.load %arg4[%c0_12, %c0_13] : memref<128x128xbf16, #tpu.memory_space<vmem>>, vector<128x128xbf16>
      %cst_14 = arith.constant dense<0.000000e+00> : vector<64x128xf32>
      %15 = tpu.matmul %13, %14, %cst_14 {dimension_numbers = #tpu.dot_dimension_numbers<[1], [0], [0], [1], [0, 0, 1, 1], [], []>} : vector<64x128xbf16>, vector<128x128xbf16>, vector<64x128xf32> -> vector<64x128xf32>
      %16 = arith.truncf %15 : vector<64x128xf32> to vector<64x128xbf16>
      %c0_15 = arith.constant 0 : index
      %c0_16 = arith.constant 0 : index
      %17 = vector.load %arg5[%c0_15, %c0_16] : memref<128x128xbf16, #tpu.memory_space<vmem>>, vector<128x128xbf16>
      %cst_17 = arith.constant dense<0.000000e+00> : vector<64x128xf32>
      %18 = tpu.matmul %16, %17, %cst_17 {dimension_numbers = #tpu.dot_dimension_numbers<[1], [0], [0], [1], [0, 0, 1, 1], [], []>} : vector<64x128xbf16>, vector<128x128xbf16>, vector<64x128xf32> -> vector<64x128xf32>
      %19 = arith.mulf %18, %18 : vector<64x128xf32>
      %cst_18 = arith.constant dense<0.000000e+00> : vector<64xf32>
      %20 = vector.multi_reduction <add>, %19, %cst_18 [1] : vector<64x128xf32> to vector<64xf32>
      %21 = vector.shape_cast %20 : vector<64xf32> to vector<64x1xf32>
      %cst_19 = arith.constant 9.99999996E-13 : f32
      %22 = vector.broadcast %cst_19 : f32 to vector<64x1xf32>
      %23 = arith.addf %21, %22 : vector<64x1xf32>
      %24 = math.rsqrt %23 : vector<64x1xf32>
      %25 = vector.broadcast %24 : vector<64x1xf32> to vector<64x128xf32>
      %26 = arith.mulf %18, %25 : vector<64x128xf32>
      %27 = arith.truncf %26 : vector<64x128xf32> to vector<64x128xbf16>
      %c0_20 = arith.constant 0 : index
      %c0_21 = arith.constant 0 : index
      %28 = vector.load %arg8[%c0_20, %c0_21] : memref<64x128xbf16, #tpu.memory_space<vmem>>, vector<64x128xbf16>
      tpu.vector_store %arg8[%c0_20, %c0_21], %27 {strides = array<i32>} : memref<64x128xbf16, #tpu.memory_space<vmem>>, vector<64x128xbf16>,
    } else {
    }
    %c0 = arith.constant 0 : index
    %c0_1 = arith.constant 0 : index
    %3 = vector.load %arg8[%c0, %c0_1] : memref<64x128xbf16, #tpu.memory_space<vmem>>, vector<64x128xbf16>
    %c0_2 = arith.constant 0 : index
    %c0_3 = arith.constant 0 : index
    %4 = vector.load %arg6[%c0_2, %c0_3] : memref<128x256xbf16, #tpu.memory_space<vmem>>, vector<128x256xbf16>
    %cst = arith.constant dense<0.000000e+00> : vector<64x256xf32>
    %5 = tpu.matmul %3, %4, %cst {dimension_numbers = #tpu.dot_dimension_numbers<[1], [0], [0], [1], [0, 0, 1, 1], [], []>} : vector<64x128xbf16>, vector<128x256xbf16>, vector<64x256xf32> -> vector<64x256xf32>
    %6 = vector.shape_cast %5 : vector<64x256xf32> to vector<8x8x256xf32>
    %cst_4 = arith.constant dense<0xFF800000> : vector<8x256xf32>
    %7 = vector.multi_reduction <maximumf>, %6, %cst_4 [0] : vector<8x8x256xf32> to vector<8x256xf32>
    %c0_5 = arith.constant 0 : index
    %c0_6 = arith.constant 0 : index
    %8 = vector.load %arg7[%c0_5, %c0_6] : memref<8x256xf32, #tpu.memory_space<vmem>>, vector<8x256xf32>
    tpu.vector_store %arg7[%c0_5, %c0_6], %7 {strides = array<i32>} : memref<8x256xf32, #tpu.memory_space<vmem>>, vector<8x256xf32>,
    return
  }
  func.func @transform_0(%arg0: i32, %arg1: i32) -> (i32, i32) {
    %c0_i32 = arith.constant 0 : i32
    %c0_i32_0 = arith.constant 0 : i32
    return %c0_i32, %arg0 : i32, i32
  }
  func.func @transform_1(%arg0: i32, %arg1: i32) -> (i32, i32) {
    %c0_i32 = arith.constant 0 : i32
    %c0_i32_0 = arith.constant 0 : i32
    %c0_i32_1 = arith.constant 0 : i32
    return %c0_i32, %c0_i32_0 : i32, i32
  }
  func.func @transform_2(%arg0: i32, %arg1: i32) -> (i32, i32) {
    %c0_i32 = arith.constant 0 : i32
    %c0_i32_0 = arith.constant 0 : i32
    %c0_i32_1 = arith.constant 0 : i32
    return %c0_i32, %c0_i32_0 : i32, i32
  }
  func.func @transform_3(%arg0: i32, %arg1: i32) -> (i32, i32) {
    %c0_i32 = arith.constant 0 : i32
    %c0_i32_0 = arith.constant 0 : i32
    %c0_i32_1 = arith.constant 0 : i32
    return %c0_i32, %c0_i32_0 : i32, i32
  }
  func.func @transform_4(%arg0: i32, %arg1: i32) -> (i32, i32) {
    %c0_i32 = arith.constant 0 : i32
    %c0_i32_0 = arith.constant 0 : i32
    return %c0_i32, %arg1 : i32, i32
  }
  func.func @transform_5(%arg0: i32, %arg1: i32) -> (i32, i32) {
    %c0_i32 = arith.constant 0 : i32
    return %arg0, %arg1 : i32, i32
  }
}

</mosaic_0001>

<bundles_post_ra>
// kernel: blip2cl_forward.1
= control target key start
LH: loop header
LB: loop body
LE: loop exit
PB: predicated region body
PF: predicated region fallthrough
CT: control target
= control target key end

     0   :  { %vm74_vm0 = vcmask 130048   ;;  %vm197_vm1 = vcmask 1040384   ;;  %vm199_vm2 = vcmask 1042434   ;;  %vm203_vm3 = vcmask 1044484   ;;  %s1506_s0 = inlined_call_operand.vmem [shape: bf16[16,1024], index: 0, kind: input, shape index: {}]   ;;  %s1507_s1 = inlined_call_operand.vmem [shape: bf16[8,16], index: 1, kind: input, shape index: {}]   ;;  %s1508_s2 = inlined_call_operand.vmem [shape: bf16[128,128], index: 2, kind: input, shape index: {}]   ;;  %s1509_s3 = inlined_call_operand.vmem [shape: bf16[128,128], index: 3, kind: input, shape index: {}]   ;;  %s1510_s4 = inlined_call_operand.vmem [shape: bf16[128,256], index: 4, kind: input, shape index: {}]   ;;  %s1511_s5 = inlined_call_operand.vmem [shape: f32[8,256], index: 5, kind: output, shape index: {}]  }
   0x1   :  { %v826_v0 = vld [vmem:[%s1506_s0] sm:$0xf]  ;;  %v1008_v2 = vld [vmem:[%s1506_s0 + $0x4] sm:$0xf]  ;;  %v834_v5 = vld [vmem:[%s1506_s0 + $0x8] sm:$0xf] }
   0x2   :  { %v1012_v1 = vld [vmem:[%s1506_s0 + $0x1c] sm:$0xf0]  ;;  %v828_v4 = vld [vmem:[%s1506_s0 + $0x20] sm:$0xf0]  ;;  %v1013_v6 = vld [vmem:[%s1506_s0 + $0x24] sm:$0xf0] }
   0x3   :  { %v827_v3 = vor.u32 %v1012_v1, %v826_v0  ;;  %v831_v7 = vor.u32 %v1008_v2, %v828_v4  ;;  %v835_v8 = vor.u32 %v1013_v6, %v834_v5  ;;  %v1009_v9 = vld [vmem:[%s1506_s0 + $0xc] sm:$0xf]  ;;  %v25_v11 = vld [vmem:[%s1507_s1] sm:$0xf]  ;;  %v850_v13 = vld [vmem:[%s1506_s0 + $0x18] sm:$0xf] }
   0x4   :  { %v836_v10 = vld [vmem:[%s1506_s0 + $0x28] sm:$0xf0]  ;;  %v1015_v14 = vld [vmem:[%s1506_s0 + $0x34] sm:$0xf0]  ;;  %v1011_v15 = vld [vmem:[%s1506_s0 + $0x1c] sm:$0xf] }
   0x5   :  { %85 = vmatpush.bf16.msra.mxu0 %v827_v3  ;;  %v839_v12 = vor.u32 %v1009_v9, %v836_v10  ;;  %98 = vmatpush.bf16.msra.mxu1 %v831_v7  ;;  %v851_v16 = vor.u32 %v1015_v14, %v850_v13  ;;  %v852_v17 = vld [vmem:[%s1506_s0 + $0x38] sm:$0xf0]  ;;  %v842_v18 = vld [vmem:[%s1506_s0 + $0x10] sm:$0xf]  ;;  %v1010_v22 = vld [vmem:[%s1506_s0 + $0x14] sm:$0xf] }
   0x6   :  { %111 = vmatpush.bf16.msra.mxu2 %v835_v8  ;;  %v1014_v19 = vld [vmem:[%s1506_s0 + $0x2c] sm:$0xf0]  ;;  %v855_v20 = vor.u32 %v1011_v15, %v852_v17  ;;  %v844_v23 = vld [vmem:[%s1506_s0 + $0x30] sm:$0xf0]  ;;  %v1023_v25 = vld [vmem:[%s1508_s2 + $0x38] sm:$0xff]  ;;  %vm205_vm4 = vcmask 1046534  }
   0x7   :  { %124 = vmatpush.bf16.msra.mxu3 %v839_v12  ;;  %v843_v21 = vor.u32 %v1014_v19, %v842_v18  ;;  %v847_v24 = vor.u32 %v1010_v22, %v844_v23  ;;  %v1022_v26 = vld [vmem:[%s1508_s2 + $0x30] sm:$0xff]  ;;  %v1021_v27 = vld [vmem:[%s1508_s2 + $0x28] sm:$0xff]  ;;  %v1020_v28 = vld [vmem:[%s1508_s2 + $0x20] sm:$0xff]  ;;  %vm211_vm5 = vcmask 1041409   ;;  %vm213_vm6 = vcmask 1043459  }
   0x8   :  { %856 = vmatmul.msk.bf16.vlgmr.msra.gmra.mxu0 %vm74_vm0, %v25_v11  ;;  %857 = vmatmul.msk.bf16.vlgmr.msra.gmra.mxu1 %vm74_vm0, %v25_v11  ;;  %v1019_v29 = vld [vmem:[%s1508_s2 + $0x18] sm:$0xff]  ;;  %v1018_v30 = vld [vmem:[%s1508_s2 + $0x10] sm:$0xff]  ;;  %v1017_v31 = vld [vmem:[%s1508_s2 + $0x8] sm:$0xff]  ;;  %vm215_vm7 = vcmask 1042433   ;;  %vm217_vm8 = vcmask 1045509   ;;  %vm219_vm9 = vcmask 1046528  }
   0x9   :  { %858 = vmatmul.msk.bf16.vlgmr.msra.gmra.mxu2 %vm74_vm0, %v25_v11  ;;  %137 = vmatpush.bf16.msrb.mxu0 %v843_v21  ;;  %v1016_v32 = vld [vmem:[%s1508_s2] sm:$0xff]  ;;  %vm201_vm10 = vcmask 1041408   ;;  %vm1515_vm11 = vcmask 1045508   ;;  %vm1514_vm12 = vcmask 1046533   ;;  %vm1512_vm13 = vcmask 1044481  }
   0xa   :  { %163 = vmatpush.bf16.msrb.mxu2 %v851_v16  ;;  %859 = vmatmul.msk.bf16.vlgmr.msra.gmra.mxu3 %vm74_vm0, %v25_v11  ;;  %vm1513_vm14 = vcmask 1043456   ;;  %vm228_vm15 = vcmask 1043458  }
   0xb   :  { %176 = vmatpush.bf16.msrb.mxu3 %v855_v20  ;;  %150 = vmatpush.bf16.msrb.mxu1 %v847_v24 }
   0xd   :  { %356 = vmatpush.bf16.msra.mxu0 %v1023_v25  ;;  %v1031_v25 = vld [vmem:[%s1509_s3 + $0x38] sm:$0xff] }
   0xf   :  { %453 = vmatpush.bf16.msra.mxu1 %v1031_v25 }
  0x11   :  { %357 = vmatpush.bf16.msra.mxu0 %v1022_v26 }
  0x15   :  { %358 = vmatpush.bf16.msra.mxu0 %v1021_v27 }
  0x18   :  { %860 = vmatmul.msk.bf16.vlgmr.msrb.gmra.mxu0 %vm74_vm0, %v25_v11  ;;  %861 = vmatmul.msk.bf16.vlgmr.msrb.gmra.mxu1 %vm74_vm0, %v25_v11 }
  0x19   :  { %862 = vmatmul.msk.bf16.vlgmr.msrb.gmra.mxu2 %vm74_vm0, %v25_v11  ;;  %359 = vmatpush.bf16.msra.mxu0 %v1020_v28 }
  0x1a   :  { %863 = vmatmul.msk.bf16.vlgmr.msrb.gmra.mxu3 %vm74_vm0, %v25_v11  ;;  %vm232_vm0 = vcmask 1045504  }
  0x1d   :  { %360 = vmatpush.bf16.msra.mxu0 %v1019_v29 }
  0x21   :  { %361 = vmatpush.bf16.msra.mxu0 %v1018_v30  ;;  %v1030_v30 = vld [vmem:[%s1509_s3 + $0x30] sm:$0xff] }
  0x22   :  { %454 = vmatpush.bf16.msra.mxu1 %v1030_v30 }
  0x25   :  { %362 = vmatpush.bf16.msra.mxu0 %v1017_v31 }
  0x29   :  { %363 = vmatpush.bf16.msra.mxu0 %v1016_v32 }
  0x85   :  { %v1204_v33 = vpop.f32.mrf.mxu0  ;;  %v100_v34 = vpop.f32.mrf.mxu1 }
  0x86   :  { %v1214_v47 = vrot.slane %v100_v34, 7 }
  0x88   :  { %v212_v59 = vsel %vm211_vm5, %v1204_v33, %v1214_v47  ;;  %v198_v0 = vsel %vm197_vm1, %v1204_v33, %v1214_v47  ;;  %v226_v16 = vsel %vm199_vm2, %v1204_v33, %v1214_v47  ;;  %v237_v17 = vsel %vm213_vm6, %v1204_v33, %v1214_v47 }
  0x8c   :  { %v113_v35 = vpop.f32.mrf.mxu2 }
  0x8d   :  { %v126_v36 = vpop.f32.mrf.mxu3  ;;  %v89_v37 = vpop.f32.mrf.mxu0  ;;  %v1206_v43 = vrot.slane %v113_v35, 6 }
  0x8e   :  { %v102_v38 = vpop.f32.mrf.mxu1  ;;  %v1208_v44 = vrot.slane %v126_v36, 5  ;;  %v248_v36 = vsel %vm203_vm3, %v1204_v33, %v1214_v47  ;;  %v256_v37 = vsel %vm217_vm8, %v1204_v33, %v1214_v47 }
  0x90   :  { %v214_v55 = vsel %vm213_vm6, %v1206_v43, %v1208_v44  ;;  %v200_v57 = vsel %vm199_vm2, %v1206_v43, %v1208_v44  ;;  %v227_v12 = vsel %vm203_vm3, %v1206_v43, %v1208_v44  ;;  %v238_v13 = vsel %vm217_vm8, %v1206_v43, %v1208_v44 }
  0x91   :  { %v216_v62 = vsel %vm215_vm7, %v212_v59, %v214_v55  ;;  %v202_v2 = vsel %vm201_vm10, %v198_v0, %v200_v57  ;;  %v229_v18 = vsel %vm228_vm15, %v226_v16, %v227_v12  ;;  %v249_v31 = vsel %vm205_vm4, %v1206_v43, %v1208_v44 }
  0x92   :  { %v257_v32 = vsel %vm219_vm9, %v1208_v44, %v1206_v43  ;;  %v265_v59 = vsel %vm197_vm1, %v1206_v43, %v1208_v44 }
  0x94   :  { %v115_v39 = vpop.f32.mrf.mxu2 }
  0x95   :  { %v128_v40 = vpop.f32.mrf.mxu3  ;;  %v139_v41 = vpop.f32.mrf.mxu0 }
  0x96   :  { %v152_v42 = vpop.f32.mrf.mxu1  ;;  %v1210_v45 = vrot.slane %v139_v41, 4  ;;  %v1029_v40 = vld [vmem:[%s1509_s3 + $0x28] sm:$0xff] }
  0x97   :  { %v1212_v46 = vrot.slane %v152_v42, 3  ;;  %455 = vmatpush.bf16.msra.mxu1 %v1029_v40  ;;  %v1048_v40 = vld [vmem:[%s1510_s4 + $0x64] sm:$0xf] }
  0x99   :  { %v204_v54 = vsel %vm203_vm3, %v1210_v45, %v1212_v46  ;;  %v218_v56 = vsel %vm217_vm8, %v1210_v45, %v1212_v46  ;;  %v230_v8 = vsel %vm205_vm4, %v1210_v45, %v1212_v46  ;;  %v241_v10 = vsel %vm219_vm9, %v1212_v46, %v1210_v45 }
  0x9a   :  { %v251_v26 = vsel %vm197_vm1, %v1210_v45, %v1212_v46  ;;  %v259_v28 = vsel %vm211_vm5, %v1210_v45, %v1212_v46  ;;  %v267_v55 = vsel %vm199_vm2, %v1210_v45, %v1212_v46  ;;  %v275_v57 = vsel %vm213_vm6, %v1210_v45, %v1212_v46 }
  0x9b   :  { %v264_v45 = vsel %vm205_vm4, %v1204_v33, %v1214_v47  ;;  %v272_v46 = vsel %vm219_vm9, %v1214_v47, %v1204_v33  ;;  %v1025_v33 = vld [vmem:[%s1509_s3 + $0x8] sm:$0xff]  ;;  %v1024_v47 = vld [vmem:[%s1509_s3] sm:$0xff] }
  0x9c   :  { %v165_v48 = vpop.f32.mrf.mxu2 }
  0x9d   :  { %v1216_v49 = vrot.slane %v165_v48, 2  ;;  %v178_v50 = vpop.f32.mrf.mxu3  ;;  %v141_v51 = vpop.f32.mrf.mxu0 }
  0x9e   :  { %v1218_v52 = vrot.slane %v178_v50, 1  ;;  %v154_v53 = vpop.f32.mrf.mxu1  ;;  %v1028_v51 = vld [vmem:[%s1509_s3 + $0x20] sm:$0xff] }
  0x9f   :  { %456 = vmatpush.bf16.msra.mxu1 %v1028_v51  ;;  %v1047_v51 = vld [vmem:[%s1510_s4 + $0x54] sm:$0xf0] }
  0xa0   :  { %v206_v58 = vsel %vm205_vm4, %v1216_v49, %v1218_v52  ;;  %v220_v60 = vsel %vm219_vm9, %v1218_v52, %v1216_v49  ;;  %v231_v9 = vsel %vm197_vm1, %v1216_v49, %v1218_v52  ;;  %v242_v11 = vsel %vm211_vm5, %v1216_v49, %v1218_v52 }
  0xa1   :  { %v208_v61 = vsel %vm1515_vm11, %v204_v54, %v206_v58  ;;  %v222_v63 = vsel %vm1514_vm12, %v218_v56, %v220_v60  ;;  %v233_v14 = vsel %vm232_vm0, %v231_v9, %v230_v8  ;;  %vm1517_vm12 = vcmask 1045506   ;;  %v1027_v54 = vld [vmem:[%s1509_s3 + $0x18] sm:$0xff] }
  0xa2   :  { %v224_v1 = vsel %vm1512_vm13, %v216_v62, %v222_v63  ;;  %v210_v5 = vsel %vm1513_vm14, %v202_v2, %v208_v61  ;;  %vm239_vm13 = vcmask 1044483   ;;  %vm243_vm14 = vcmask 1046529   ;;  %v1026_v2 = vld [vmem:[%s1509_s3 + $0x10] sm:$0xff] }
  0xa3   :  { %v225_v3 = vrot.slane %v224_v1, 1  ;;  %v244_v15 = vsel %vm243_vm14, %v242_v11, %v241_v10  ;;  %vm1516_vm11 = vcmask 1046531   ;;  %v240_v19 = vsel %vm239_vm13, %v237_v17, %v238_v13  ;;  %457 = vmatpush.bf16.msra.mxu1 %v1027_v54 }
  0xa4   :  { %v167_v4 = vpop.f32.mrf.mxu2  ;;  %v235_v20 = vsel %vm1517_vm12, %v229_v18, %v233_v14  ;;  %v246_v21 = vsel %vm1516_vm11, %v240_v19, %v244_v15  ;;  %v252_v27 = vsel %vm199_vm2, %v1216_v49, %v1218_v52  ;;  %v260_v29 = vsel %vm213_vm6, %v1216_v49, %v1218_v52 }
  0xa5   :  { %v180_v6 = vpop.f32.mrf.mxu3  ;;  %v288_v7 = vpack.c.bf16 %v225_v3, %v210_v5  ;;  %v236_v22 = vrot.slane %v235_v20, 2  ;;  %v247_v23 = vrot.slane %v246_v21, 3  ;;  %v253_v34 = vsel %vm201_vm10, %v251_v26, %v252_v27 }
  0xa6   :  { %v261_v35 = vsel %vm215_vm7, %v259_v28, %v260_v29  ;;  %vm1518_vm11 = vcmask 1045508   ;;  %vm1519_vm12 = vcmask 1046533   ;;  %vm1520_vm10 = vcmask 1043456  }
  0xa7   :  { %364 = vmatmul.bf16.vlgmr.msra.gmra.mxu0 %v288_v7  ;;  %v289_v24 = vpack.c.bf16 %v247_v23, %v236_v22  ;;  %v250_v38 = vsel %vm1518_vm11, %v248_v36, %v249_v31  ;;  %v258_v39 = vsel %vm1519_vm12, %v256_v37, %v257_v32  ;;  %vm1521_vm7 = vcmask 1044481   ;;  %458 = vmatpush.bf16.msra.mxu1 %v1026_v2  ;;  %v1002_v31 = vld [vmem:[%s1510_s4 + $0x70] sm:$0xf]  ;;  %v1051_v32 = vld [vmem:[%s1510_s4 + $0x74] sm:$0xf0] }
  0xa8   :  { %v254_v41 = vsel %vm1520_vm10, %v253_v34, %v250_v38  ;;  %v262_v42 = vsel %vm1521_vm7, %v261_v35, %v258_v39  ;;  %v268_v56 = vsel %vm203_vm3, %v1216_v49, %v1218_v52  ;;  %v276_v58 = vsel %vm217_vm8, %v1216_v49, %v1218_v52  ;;  %v1050_v34 = vld [vmem:[%s1510_s4 + $0x74] sm:$0xf]  ;;  %v1004_v36 = vld [vmem:[%s1510_s4 + $0x78] sm:$0xf0]  ;;  %v994_v38 = vld [vmem:[%s1510_s4 + $0x60] sm:$0xf] }
  0xa9   :  { %v255_v48 = vrot.slane %v254_v41, 4  ;;  %v263_v50 = vrot.slane %v262_v42, 5  ;;  %v273_v60 = vsel %vm211_vm5, %v1206_v43, %v1208_v44  ;;  %v269_v61 = vsel %vm228_vm15, %v267_v55, %v268_v56  ;;  %v1049_v39 = vld [vmem:[%s1510_s4 + $0x64] sm:$0xf0]  ;;  %v996_v42 = vld [vmem:[%s1510_s4 + $0x68] sm:$0xf0] }
  0xaa   :  { %v277_v62 = vsel %vm239_vm13, %v275_v57, %v276_v58  ;;  %v266_v49 = vsel %vm232_vm0, %v265_v59, %v264_v45  ;;  %v274_v52 = vsel %vm243_vm14, %v273_v60, %v272_v46  ;;  %vm1522_vm1 = vcmask 1045506   ;;  %v988_v55 = vld [vmem:[%s1510_s4 + $0x58] sm:$0xf0]  ;;  %v978_v57 = vld [vmem:[%s1510_s4 + $0x40] sm:$0xf] }
  0xab   :  { %v290_v53 = vpack.c.bf16 %v263_v50, %v255_v48  ;;  %v270_v63 = vsel %vm1522_vm1, %v269_v61, %v266_v49  ;;  %vm1523_vm2 = vcmask 1046531   ;;  %459 = vmatpush.bf16.msra.mxu1 %v1025_v33  ;;  %v1003_v35 = vor.u32 %v1051_v32, %v1002_v31  ;;  %v986_v50 = vld [vmem:[%s1510_s4 + $0x50] sm:$0xf]  ;;  %v1045_v58 = vld [vmem:[%s1510_s4 + $0x44] sm:$0xf0] }
  0xac   :  { %v278_v43 = vsel %vm1523_vm2, %v277_v62, %v274_v52  ;;  %v271_v44 = vrot.slane %v270_v63, 6  ;;  %v1007_v37 = vor.u32 %v1050_v34, %v1004_v36  ;;  %v995_v41 = vor.u32 %v1049_v39, %v994_v38  ;;  %v1044_v59 = vld [vmem:[%s1510_s4 + $0x44] sm:$0xf]  ;;  %v980_v61 = vld [vmem:[%s1510_s4 + $0x48] sm:$0xf0] }
  0xad   :  { %v279_v0 = vrot.slane %v278_v43, 7  ;;  %746 = vmatpush.bf16.msra.mxu2 %v1003_v35  ;;  %v999_v48 = vor.u32 %v1048_v40, %v996_v42  ;;  %v987_v54 = vor.u32 %v1047_v51, %v986_v50  ;;  %v979_v60 = vor.u32 %v1045_v58, %v978_v57  ;;  %v970_v45 = vld [vmem:[%s1510_s4 + $0x30] sm:$0xf]  ;;  %v1043_v46 = vld [vmem:[%s1510_s4 + $0x34] sm:$0xf0] }
  0xae   :  { %775 = vmatpush.bf16.msra.mxu3 %v1007_v37  ;;  %v983_v62 = vor.u32 %v1044_v59, %v980_v61  ;;  %v1042_v49 = vld [vmem:[%s1510_s4 + $0x34] sm:$0xf]  ;;  %v971_v52 = vor.u32 %v1043_v46, %v970_v45  ;;  %v972_v63 = vld [vmem:[%s1510_s4 + $0x38] sm:$0xf0]  ;;  %v1041_v2 = vld [vmem:[%s1510_s4 + $0x24] sm:$0xf0] }
  0xaf   :  { %v291_v1 = vpack.c.bf16 %v279_v0, %v271_v44  ;;  %460 = vmatpush.bf16.msra.mxu1 %v1024_v47  ;;  %v975_v43 = vor.u32 %v1042_v49, %v972_v63  ;;  %v1040_v47 = vld [vmem:[%s1510_s4 + $0x24] sm:$0xf] }
  0xb1   :  { %747 = vmatpush.bf16.msra.mxu2 %v995_v41 }
  0xb2   :  { %776 = vmatpush.bf16.msra.mxu3 %v999_v48 }
  0xb5   :  { %748 = vmatpush.bf16.msra.mxu2 %v987_v54 }
  0xb7   :  { %369 = vmatmul.bf16.gmra.mxu0 %v289_v24 }
  0xb9   :  { %749 = vmatpush.bf16.msra.mxu2 %v979_v60 }
  0xbd   :  { %750 = vmatpush.bf16.msra.mxu2 %v971_v52 }
  0xc7   :  { %374 = vmatmul.bf16.gmra.mxu0 %v290_v53  ;;  %v1046_v53 = vld [vmem:[%s1510_s4 + $0x54] sm:$0xf] }
  0xc8   :  { %v991_v56 = vor.u32 %v1046_v53, %v988_v55 }
  0xca   :  { %777 = vmatpush.bf16.msra.mxu3 %v991_v56 }
  0xce   :  { %778 = vmatpush.bf16.msra.mxu3 %v983_v62 }
  0xd2   :  { %779 = vmatpush.bf16.msra.mxu3 %v975_v43 }
  0xd7   :  { %379 = vmatmul.bf16.gmra.mxu0 %v291_v1  ;;  %v962_v1 = vld [vmem:[%s1510_s4 + $0x20] sm:$0xf] }
  0xd8   :  { %v963_v33 = vor.u32 %v1041_v2, %v962_v1 }
  0xda   :  { %751 = vmatpush.bf16.msra.mxu2 %v963_v33 }
 0x124   :  { %v365_v3 = vpop.f32.mrf.mxu0 }
 0x12c   :  { %v367_v4 = vpop.f32.mrf.mxu0 }
 0x12d   :  { %v385_v5 = vpack.c.bf16 %v367_v4, %v365_v3  ;;  %v964_v3 = vld [vmem:[%s1510_s4 + $0x28] sm:$0xf0] }
 0x12e   :  { %v967_v4 = vor.u32 %v1040_v47, %v964_v3 }
 0x12f   :  { %461 = vmatmul.bf16.vlgmr.msra.gmra.mxu1 %v385_v5  ;;  %v954_v5 = vld [vmem:[%s1510_s4 + $0x10] sm:$0xf] }
 0x130   :  { %780 = vmatpush.bf16.msra.mxu3 %v967_v4 }
 0x134   :  { %v370_v6 = vpop.f32.mrf.mxu0 }
 0x13c   :  { %v372_v7 = vpop.f32.mrf.mxu0 }
 0x13d   :  { %v386_v8 = vpack.c.bf16 %v372_v7, %v370_v6  ;;  %v1039_v6 = vld [vmem:[%s1510_s4 + $0x14] sm:$0xf0]  ;;  %v1038_v7 = vld [vmem:[%s1510_s4 + $0x14] sm:$0xf] }
 0x13f   :  { %466 = vmatmul.bf16.gmra.mxu1 %v386_v8  ;;  %v955_v8 = vor.u32 %v1039_v6, %v954_v5 }
 0x141   :  { %752 = vmatpush.bf16.msra.mxu2 %v955_v8 }
 0x144   :  { %v375_v9 = vpop.f32.mrf.mxu0 }
 0x14c   :  { %v377_v10 = vpop.f32.mrf.mxu0 }
 0x14d   :  { %v387_v11 = vpack.c.bf16 %v377_v10, %v375_v9  ;;  %v956_v9 = vld [vmem:[%s1510_s4 + $0x18] sm:$0xf0] }
 0x14e   :  { %v959_v10 = vor.u32 %v1038_v7, %v956_v9 }
 0x14f   :  { %471 = vmatmul.bf16.gmra.mxu1 %v387_v11 }
 0x150   :  { %781 = vmatpush.bf16.msra.mxu3 %v959_v10 }
 0x154   :  { %v380_v12 = vpop.f32.mrf.mxu0 }
 0x15c   :  { %v382_v13 = vpop.f32.mrf.mxu0 }
 0x15d   :  { %v388_v14 = vpack.c.bf16 %v382_v13, %v380_v12 }
 0x15f   :  { %476 = vmatmul.bf16.gmra.mxu1 %v388_v14  ;;  %v946_v14 = vld [vmem:[%s1510_s4] sm:$0xf] }
 0x1ac   :  { %v1364_v15 = vpop.f32.mrf.mxu1 }
 0x1ad   :  { %v482_v16 = vmul.f32 %v1364_v15, %v1364_v15 }
 0x1af   :  { %490 = vadd.xlane.f32.xlu0 %v482_v16  ;;  %v1037_v16 = vld [vmem:[%s1510_s4 + $0x4] sm:$0xf0] }
 0x1b4   :  { %v1368_v17 = vpop.f32.mrf.mxu1 }
 0x1b5   :  { %v483_v18 = vmul.f32 %v1368_v17, %v1368_v17 }
 0x1b7   :  { %492 = vadd.xlane.f32.xlu0 %v483_v18 }
 0x1bc   :  { %v1372_v19 = vpop.f32.mrf.mxu1 }
 0x1bd   :  { %v484_v20 = vmul.f32 %v1372_v19, %v1372_v19 }
 0x1bf   :  { %494 = vadd.xlane.f32.xlu1 %v484_v20  ;;  %v947_v20 = vor.u32 %v1037_v16, %v946_v14 }
 0x1c1   :  { %753 = vmatpush.bf16.msra.mxu2 %v947_v20 }
 0x1c4   :  { %v1376_v21 = vpop.f32.mrf.mxu1 }
 0x1c5   :  { %v485_v22 = vmul.f32 %v1376_v21, %v1376_v21 }
 0x1c7   :  { %496 = vadd.xlane.f32.xlu1 %v485_v22  ;;  %v1036_v22 = vld [vmem:[%s1510_s4 + $0x4] sm:$0xf] }
 0x1cc   :  { %v1380_v23 = vpop.f32.mrf.mxu1 }
 0x1cd   :  { %v486_v24 = vmul.f32 %v1380_v23, %v1380_v23 }
 0x1cf   :  { %498 = vadd.xlane.f32.xlu2 %v486_v24  ;;  %v948_v24 = vld [vmem:[%s1510_s4 + $0x8] sm:$0xf0] }
 0x1d4   :  { %v1384_v25 = vpop.f32.mrf.mxu1 }
 0x1d5   :  { %v487_v26 = vmul.f32 %v1384_v25, %v1384_v25 }
 0x1d7   :  { %500 = vadd.xlane.f32.xlu2 %v487_v26  ;;  %v951_v26 = vor.u32 %v1036_v22, %v948_v24 }
 0x1d9   :  { %782 = vmatpush.bf16.msra.mxu3 %v951_v26 }
 0x1dc   :  { %v1388_v27 = vpop.f32.mrf.mxu1 }
 0x1dd   :  { %v488_v28 = vmul.f32 %v1388_v27, %v1388_v27 }
 0x1df   :  { %502 = vadd.xlane.f32.xlu0 %v488_v28 }
 0x1e4   :  { %v1392_v29 = vpop.f32.mrf.mxu1 }
 0x1e5   :  { %v489_v30 = vmul.f32 %v1392_v29, %v1392_v29 }
 0x1e7   :  { %504 = vadd.xlane.f32.xlu1 %v489_v30 }
 0x222   :  { %v491_v44 = vpop.xlane.xlu0 %490 }
 0x223   :  { %v506_v0 = vadd.f32 1e-12, %v491_v44 }
 0x225   :  { %1075 = vrsqrt.f32 %v506_v0  ;;  %vm520_vm4 = vweird.f32 %v506_v0 }
 0x22a   :  { %v493_v11 = vpop.xlane.xlu0 %492 }
 0x22b   :  { %v1076_v12 = vpop.eup %1075  ;;  %v507_v13 = vadd.f32 1e-12, %v493_v11 }
 0x22c   :  { %v515_v18 = vmul.f32 %v1076_v12, %v506_v0  ;;  %vm521_vm3 = vweird.f32 %v1076_v12 }
 0x22d   :  { %1077 = vrsqrt.f32 %v507_v13  ;;  %vm522_vm6 = vmor %vm520_vm4, %vm521_vm3  ;;  %vm530_vm8 = vweird.f32 %v507_v13 }
 0x22e   :  { %v516_v28 = vmul.f32 %v1076_v12, %v515_v18 }
 0x230   :  { %v517_v30 = vmul.f32 0.5, %v516_v28 }
 0x232   :  { %v495_v31 = vpop.xlane.xlu1 %494  ;;  %v518_v35 = vsub.f32 1.5, %v517_v30 }
 0x233   :  { %v1078_v32 = vpop.eup %1077  ;;  %v508_v34 = vadd.f32 1e-12, %v495_v31 }
 0x234   :  { %v525_v36 = vmul.f32 %v1078_v32, %v507_v13  ;;  %v519_v38 = vmul.f32 %v1076_v12, %v518_v35  ;;  %vm531_vm5 = vweird.f32 %v1078_v32 }
 0x235   :  { %1079 = vrsqrt.f32 %v508_v34  ;;  %vm532_vm9 = vmor %vm530_vm8, %vm531_vm5  ;;  %vm540_vm12 = vweird.f32 %v508_v34 }
 0x236   :  { %v526_v37 = vmul.f32 %v1078_v32, %v525_v36  ;;  %v523_v50 = vsel %vm522_vm6, %v1076_v12, %v519_v38 }
 0x237   :  { %v594_v56 = vmul.f32 %v523_v50, %v1364_v15 }
 0x238   :  { %v527_v39 = vmul.f32 0.5, %v526_v37 }
 0x23a   :  { %v528_v40 = vsub.f32 1.5, %v527_v39  ;;  %v497_v41 = vpop.xlane.xlu1 %496 }
 0x23b   :  { %v1080_v42 = vpop.eup %1079  ;;  %v509_v48 = vadd.f32 1e-12, %v497_v41 }
 0x23c   :  { %v529_v51 = vmul.f32 %v1078_v32, %v528_v40  ;;  %v535_v53 = vmul.f32 %v1080_v42, %v508_v34  ;;  %vm541_vm11 = vweird.f32 %v1080_v42 }
 0x23d   :  { %1081 = vrsqrt.f32 %v509_v48  ;;  %vm542_vm14 = vmor %vm540_vm12, %vm541_vm11  ;;  %vm550_vm15 = vweird.f32 %v509_v48 }
 0x23e   :  { %v533_v54 = vsel %vm532_vm9, %v1078_v32, %v529_v51  ;;  %v536_v55 = vmul.f32 %v1080_v42, %v535_v53 }
 0x23f   :  { %v595_v57 = vmul.f32 %v533_v54, %v1368_v17 }
 0x240   :  { %v537_v58 = vmul.f32 0.5, %v536_v55 }
 0x241   :  { %v1055_v59 = vpack.c.bf16 %v595_v57, %v594_v56 }
 0x242   :  { %v499_v60 = vpop.xlane.xlu2 %498  ;;  %v538_v45 = vsub.f32 1.5, %v537_v58 }
 0x243   :  { %v1082_v61 = vpop.eup %1081  ;;  %1056 = vst [vmem:[#allocation2 + $0x10] sm:$0xff] %v1055_v59   ;;  %v510_v62 = vadd.f32 1e-12, %v499_v60 }
 0x244   :  { %v545_v46 = vmul.f32 %v1082_v61, %v509_v48  ;;  %v539_v52 = vmul.f32 %v1080_v42, %v538_v45  ;;  %vm551_vm13 = vweird.f32 %v1082_v61 }
 0x245   :  { %1083 = vrsqrt.f32 %v510_v62  ;;  %vm552_vm0 = vmor %vm550_vm15, %vm551_vm13  ;;  %vm560_vm7 = vweird.f32 %v510_v62 }
 0x246   :  { %v546_v49 = vmul.f32 %v1082_v61, %v545_v46  ;;  %v543_v1 = vsel %vm542_vm14, %v1080_v42, %v539_v52 }
 0x247   :  { %v596_v4 = vmul.f32 %v543_v1, %v1372_v19 }
 0x248   :  { %v547_v63 = vmul.f32 0.5, %v546_v49 }
 0x24a   :  { %v548_v43 = vsub.f32 1.5, %v547_v63  ;;  %v501_v44 = vpop.xlane.xlu2 %500  ;;  %v1032_v15 = vld [vmem:[#allocation2 + $0x10] sm:$0xff] }
 0x24b   :  { %v1084_v0 = vpop.eup %1083  ;;  %v511_v17 = vadd.f32 1e-12, %v501_v44  ;;  %754 = vmatmul.bf16.vlgmr.msra.gmra.mxu2 %v1032_v15  ;;  %783 = vmatmul.bf16.vlgmr.msra.gmra.mxu3 %v1032_v15 }
 0x24c   :  { %v549_v2 = vmul.f32 %v1082_v61, %v548_v43  ;;  %v555_v33 = vmul.f32 %v1084_v0, %v510_v62  ;;  %vm561_vm10 = vweird.f32 %v1084_v0 }
 0x24d   :  { %1085 = vrsqrt.f32 %v511_v17  ;;  %vm562_vm2 = vmor %vm560_vm7, %vm561_vm10  ;;  %vm570_vm3 = vweird.f32 %v511_v17 }
 0x24e   :  { %v553_v47 = vsel %vm552_vm0, %v1082_v61, %v549_v2  ;;  %v556_v3 = vmul.f32 %v1084_v0, %v555_v33 }
 0x24f   :  { %v597_v5 = vmul.f32 %v553_v47, %v1376_v21 }
 0x250   :  { %v557_v6 = vmul.f32 0.5, %v556_v3 }
 0x251   :  { %v1060_v7 = vpack.c.bf16 %v597_v5, %v596_v4 }
 0x252   :  { %v503_v8 = vpop.xlane.xlu0 %502  ;;  %v558_v11 = vsub.f32 1.5, %v557_v6 }
 0x253   :  { %v1086_v9 = vpop.eup %1085  ;;  %1072 = vst [vmem:[#allocation2] sm:$0xff] %v1060_v7   ;;  %v512_v10 = vadd.f32 1e-12, %v503_v8 }
 0x254   :  { %v565_v12 = vmul.f32 %v1086_v9, %v511_v17  ;;  %v559_v14 = vmul.f32 %v1084_v0, %v558_v11  ;;  %vm571_vm1 = vweird.f32 %v1086_v9 }
 0x255   :  { %1087 = vrsqrt.f32 %v512_v10  ;;  %vm572_vm4 = vmor %vm570_vm3, %vm571_vm1  ;;  %vm580_vm6 = vweird.f32 %v512_v10 }
 0x256   :  { %v566_v13 = vmul.f32 %v1086_v9, %v565_v12  ;;  %v563_v24 = vsel %vm562_vm2, %v1084_v0, %v559_v14 }
 0x257   :  { %v598_v32 = vmul.f32 %v563_v24, %v1380_v23 }
 0x258   :  { %v567_v16 = vmul.f32 0.5, %v566_v13 }
 0x25a   :  { %v568_v18 = vsub.f32 1.5, %v567_v16  ;;  %v505_v20 = vpop.xlane.xlu1 %504  ;;  %v1033_v19 = vld [vmem:[#allocation2] sm:$0xff] }
 0x25b   :  { %v1088_v22 = vpop.eup %1087  ;;  %v513_v21 = vadd.f32 1e-12, %v505_v20  ;;  %759 = vmatmul.bf16.gmra.mxu2 %v1033_v19  ;;  %788 = vmatmul.bf16.gmra.mxu3 %v1033_v19 }
 0x25c   :  { %v569_v26 = vmul.f32 %v1086_v9, %v568_v18  ;;  %v575_v28 = vmul.f32 %v1088_v22, %v512_v10  ;;  %vm581_vm5 = vweird.f32 %v1088_v22 }
 0x25d   :  { %1089 = vrsqrt.f32 %v513_v21  ;;  %vm582_vm9 = vmor %vm580_vm6, %vm581_vm5  ;;  %vm590_vm11 = vweird.f32 %v513_v21 }
 0x25e   :  { %v573_v30 = vsel %vm572_vm4, %v1086_v9, %v569_v26  ;;  %v576_v31 = vmul.f32 %v1088_v22, %v575_v28 }
 0x25f   :  { %v599_v34 = vmul.f32 %v573_v30, %v1384_v25 }
 0x260   :  { %v577_v35 = vmul.f32 0.5, %v576_v31 }
 0x261   :  { %v1065_v36 = vpack.c.bf16 %v599_v34, %v598_v32 }
 0x262   :  { %v578_v38 = vsub.f32 1.5, %v577_v35 }
 0x263   :  { %v1090_v37 = vpop.eup %1089  ;;  %1073 = vst [vmem:[#allocation2 + $0x18] sm:$0xff] %v1065_v36  }
 0x264   :  { %v585_v39 = vmul.f32 %v1090_v37, %v513_v21  ;;  %v579_v41 = vmul.f32 %v1088_v22, %v578_v38  ;;  %vm591_vm8 = vweird.f32 %v1090_v37 }
 0x265   :  { %vm592_vm12 = vmor %vm590_vm11, %vm591_vm8 }
 0x266   :  { %v586_v40 = vmul.f32 %v1090_v37, %v585_v39  ;;  %v583_v51 = vsel %vm582_vm9, %v1088_v22, %v579_v41 }
 0x267   :  { %v600_v25 = vmul.f32 %v583_v51, %v1388_v27 }
 0x268   :  { %v587_v42 = vmul.f32 0.5, %v586_v40 }
 0x26a   :  { %v588_v48 = vsub.f32 1.5, %v587_v42  ;;  %v1034_v50 = vld [vmem:[#allocation2 + $0x18] sm:$0xff] }
 0x26b   :  { %764 = vmatmul.bf16.gmra.mxu2 %v1034_v50  ;;  %793 = vmatmul.bf16.gmra.mxu3 %v1034_v50 }
 0x26c   :  { %v589_v53 = vmul.f32 %v1090_v37, %v588_v48 }
 0x26e   :  { %v593_v23 = vsel %vm592_vm12, %v1090_v37, %v589_v53 }
 0x26f   :  { %v601_v54 = vmul.f32 %v593_v23, %v1392_v29 }
 0x271   :  { %v1070_v55 = vpack.c.bf16 %v601_v54, %v600_v25 }
 0x273   :  { %1074 = vst [vmem:[#allocation2 + $0x8] sm:$0xff] %v1070_v55  }
 0x27a   :  { %v1035_v56 = vld [vmem:[#allocation2 + $0x8] sm:$0xff] }
 0x27b   :  { %769 = vmatmul.bf16.gmra.mxu2 %v1035_v56  ;;  %798 = vmatmul.bf16.gmra.mxu3 %v1035_v56 }
 0x2ce   :  { %v755_v57 = vpop.f32.mrf.mxu2  ;;  %v784_v58 = vpop.f32.mrf.mxu3 }
 0x2d6   :  { %v757_v59 = vpop.f32.mrf.mxu2  ;;  %v786_v60 = vpop.f32.mrf.mxu3 }
 0x2de   :  { %v760_v61 = vpop.f32.mrf.mxu2  ;;  %v789_v62 = vpop.f32.mrf.mxu3 }
 0x2df   :  { %v804_v29 = vmax.f32 %v755_v57, %v760_v61  ;;  %v811_v15 = vmax.f32 %v784_v58, %v789_v62 }
 0x2e6   :  { %v762_v45 = vpop.f32.mrf.mxu2  ;;  %v791_v46 = vpop.f32.mrf.mxu3 }
 0x2e7   :  { %v805_v0 = vmax.f32 %v757_v59, %v762_v45  ;;  %v812_v17 = vmax.f32 %v786_v60, %v791_v46 }
 0x2ee   :  { %v765_v49 = vpop.f32.mrf.mxu2  ;;  %v794_v52 = vpop.f32.mrf.mxu3 }
 0x2ef   :  { %v806_v1 = vmax.f32 %v804_v29, %v765_v49  ;;  %v813_v2 = vmax.f32 %v811_v15, %v794_v52 }
 0x2f6   :  { %v767_v63 = vpop.f32.mrf.mxu2  ;;  %v796_v43 = vpop.f32.mrf.mxu3 }
 0x2f7   :  { %v807_v33 = vmax.f32 %v805_v0, %v767_v63  ;;  %v814_v47 = vmax.f32 %v812_v17, %v796_v43 }
 0x2fe   :  { %v770_v27 = vpop.f32.mrf.mxu2  ;;  %v799_v44 = vpop.f32.mrf.mxu3 }
 0x2ff   :  { %v808_v5 = vmax.f32 %v806_v1, %v770_v27  ;;  %v815_v6 = vmax.f32 %v813_v2, %v799_v44 }
 0x306   :  { %v772_v3 = vpop.f32.mrf.mxu2  ;;  %v801_v4 = vpop.f32.mrf.mxu3 }
 0x307   :  { %v809_v7 = vmax.f32 %v807_v33, %v772_v3  ;;  %v816_v8 = vmax.f32 %v814_v47, %v801_v4 }
 0x309   :  { %v810_v9 = vmax.f32 %v808_v5, %v809_v7  ;;  %v817_v10 = vmax.f32 %v815_v6, %v816_v8 }
 0x30b   :  { %818 = vst [vmem:[%s1511_s5] sm:$0xff] %v810_v9 }
 0x30c   :  { %819 = vst [vmem:[%s1511_s5 + $0x8] sm:$0xff] %v817_v10 }

</bundles_post_ra>
